<compile_context>
chip_gen: v5e
topology: v5e:2x2
jax: 0.10.0
libtpu: 0.0.40
codegen_flags: <defaults>
</compile_context>

<pallas_src>
import functools
import math

import jax
import jax.numpy as jnp
from jax import lax
from jax.experimental import pallas as pl
from jax.experimental.pallas import tpu as pltpu

LANES = 128
TARGET_BLOCK_ELEMS = 1024 * 1024     # ~4 MiB f32 / ~2 MiB bf16 per input block
VMEM_LIMIT_CAP = 48 << 20            # stays well under v7x's 64 MiB physical VMEM


def _sublane_multiple(dtype):
    """Minimum sublane multiple for a packed dtype (8 f32, 16 bf16, 32 int8)."""
    bits = jnp.dtype(dtype).itemsize * 8
    return max(8, (32 // max(bits, 1)) * 8)


@functools.lru_cache(maxsize=None)
def _tensorcores_per_chip():
    """Best-effort TensorCores-per-chip detection (2 on v7x, 1 on v5e/v6e)."""
    try:
        info = pltpu.get_tpu_info()
    except Exception:
        return 1
    for attr in ("num_cores", "num_tensorcores", "num_tensor_cores",
                 "tensorcores_per_chip", "cores_per_chip"):
        v = getattr(info, attr, None)
        if isinstance(v, int) and v in (1, 2):
            return v
    cv = getattr(info, "chip_version", None)
    if cv is not None and "7" in str(cv):
        return 2
    return 1


# ---------------------------------------------------------------------------
# Elementwise kernel (reduction='none'): sqrt((p - t)^2 + eps) per element.
# Cast to f32 happens in-kernel (VALU slack is huge; the kernel is DMA bound).
# ---------------------------------------------------------------------------
def _rmse_elem_kernel(p_ref, t_ref, o_ref, *, eps):
    diff = p_ref[...].astype(jnp.float32) - t_ref[...].astype(jnp.float32)
    o_ref[...] = jnp.sqrt(diff * diff + eps).astype(o_ref.dtype)


# ---------------------------------------------------------------------------
# Reduction kernel: split c accumulates its tiles into an (8, cols) f32 VMEM
# accumulator (pure VPU adds) and writes it out once at the last tile.
# ---------------------------------------------------------------------------
def _rmse_sum_kernel(p_ref, t_ref, o_ref, acc_ref, *, eps, tile_rows,
                     total_rows, tiles_per_split, needs_tail_mask):
    c = pl.program_id(0)
    k = pl.program_id(1)

    @pl.when(k == 0)
    def _():
        acc_ref[...] = jnp.zeros_like(acc_ref)

    diff = p_ref[...].astype(jnp.float32) - t_ref[...].astype(jnp.float32)
    val = jnp.sqrt(diff * diff + eps)

    def _accumulate(v):
        # (tile_rows, cols) -> (tile_rows//8, 8, cols): reinterpretation of the
        # sublane-major axis, then elementwise VPU adds into the accumulator.
        acc_ref[...] += v.reshape(tile_rows // 8, 8, v.shape[-1]).sum(axis=0)

    if needs_tail_mask:
        # Row-granularity masking, executed only on tiles that overrun.
        row0 = (c * tiles_per_split + k) * tile_rows

        @pl.when(row0 + tile_rows <= total_rows)
        def _():
            _accumulate(val)

        @pl.when(row0 + tile_rows > total_rows)
        def _():
            rid = row0 + lax.broadcasted_iota(jnp.int32, val.shape, 0)
            _accumulate(jnp.where(rid < total_rows, val, 0.0))
    else:
        _accumulate(val)

    @pl.when(k == pl.num_programs(1) - 1)
    def _():
        o_ref[...] = acc_ref[...]


def rmse_loss(y_pred, y_true, reduction="mean", eps=1e-9):
    assert y_pred.shape == y_true.shape
    if reduction not in ("mean", "sum", "none"):
        raise ValueError(f"unknown reduction: {reduction}")

    orig_shape = y_pred.shape
    n = math.prod(orig_shape)
    eps = float(eps)

    out_dtype = jnp.result_type(y_pred.dtype, y_true.dtype)
    if not jnp.issubdtype(out_dtype, jnp.floating):
        out_dtype = jnp.float32

    def _xla_elem(p, t):
        d = p.astype(jnp.float32) - t.astype(jnp.float32)
        return jnp.sqrt(d * d + eps)

    # Lane-dense 2D layout in the NATIVE dtype (no wrapper upcast / no pad).
    sub_mult = max(_sublane_multiple(y_pred.dtype),
                   _sublane_multiple(y_true.dtype),
                   _sublane_multiple(out_dtype))
    cols = None
    for c in (1024, 512, 256, 128):
        if n % (sub_mult * c) == 0:
            cols = c
            break
    if cols is None:
        cols = LANES
    n_main = (n // (sub_mult * cols)) * (sub_mult * cols)
    n_rem = n - n_main

    p_flat = y_pred.reshape(-1)
    t_flat = y_true.reshape(-1)

    if n_main == 0:
        # Tiny input: a Pallas launch is not worth it.
        elem = _xla_elem(p_flat, t_flat)
        if reduction == "none":
            return elem.astype(out_dtype).reshape(orig_shape)
        total = elem.sum()
        return total if reduction == "sum" else total / jnp.float32(n)

    rows = n_main // cols                         # multiple of sub_mult
    if n_rem:
        # Rare awkward-size path: the kernel covers the aligned prefix and the
        # tiny remainder is folded in XLA (much cheaper than jnp.pad copies).
        p2d = p_flat[:n_main].reshape(rows, cols)
        t2d = t_flat[:n_main].reshape(rows, cols)
    else:
        p2d = p_flat.reshape(rows, cols)
        t2d = t_flat.reshape(rows, cols)

    target_rows = max(sub_mult,
                      (TARGET_BLOCK_ELEMS // cols) // sub_mult * sub_mult)
    tile_rows = min(target_rows, rows)            # multiple of sub_mult
    n_tiles = (rows + tile_rows - 1) // tile_rows

    ncores = _tensorcores_per_chip()
    in_itemsize = p2d.dtype.itemsize + t2d.dtype.itemsize

    if reduction == "none":
        blk_bytes = tile_rows * cols * (in_itemsize + jnp.dtype(out_dtype).itemsize)
        vmem_limit = min(int(2 * blk_bytes * 1.5) + (2 << 20), VMEM_LIMIT_CAP)
        if ncores >= 2 and n_tiles % ncores == 0:
            sem = (pltpu.CORE_PARALLEL,)          # shard tiles across v7x's 2 TCs
        else:
            sem = (pltpu.PARALLEL,)
        out2d = pl.pallas_call(
            functools.partial(_rmse_elem_kernel, eps=eps),
            out_shape=jax.ShapeDtypeStruct((rows, cols), out_dtype),
            grid_spec=pltpu.PrefetchScalarGridSpec(
                num_scalar_prefetch=0,
                grid=(n_tiles,),
                in_specs=[pl.BlockSpec((tile_rows, cols), lambda i: (i, 0)),
                          pl.BlockSpec((tile_rows, cols), lambda i: (i, 0))],
                out_specs=pl.BlockSpec((tile_rows, cols), lambda i: (i, 0)),
            ),
            compiler_params=pltpu.CompilerParams(
                dimension_semantics=sem, vmem_limit_bytes=vmem_limit),
        )(p2d, t2d)
        flat_out = out2d.reshape(-1)
        if n_rem:
            tail = _xla_elem(p_flat[n_main:], t_flat[n_main:]).astype(out_dtype)
            flat_out = jnp.concatenate([flat_out, tail])
        return flat_out.reshape(orig_shape)

    # 'mean' / 'sum': split tiles across TensorCores only when there are >= 2.
    nsplit = ncores if (ncores >= 2 and n_tiles >= ncores) else 1
    tiles_per_split = (n_tiles + nsplit - 1) // nsplit
    covered_tiles = nsplit * tiles_per_split
    needs_tail_mask = (rows % tile_rows != 0) or (covered_tiles != n_tiles)

    def in_map(c, k):
        g = c * tiles_per_split + k
        if covered_tiles != n_tiles:
            # Keep the read window in-bounds; duplicate tiles are fully masked
            # inside the kernel so they contribute zero.
            g = jnp.minimum(g, n_tiles - 1)
        return (g, 0)

    blk_bytes = tile_rows * cols * in_itemsize
    vmem_limit = min(int(2 * blk_bytes * 1.5) + (2 << 20), VMEM_LIMIT_CAP)
    sem = ((pltpu.CORE_PARALLEL, pltpu.ARBITRARY) if nsplit > 1
           else (pltpu.ARBITRARY, pltpu.ARBITRARY))

    partials = pl.pallas_call(
        functools.partial(
            _rmse_sum_kernel, eps=eps, tile_rows=tile_rows, total_rows=rows,
            tiles_per_split=tiles_per_split, needs_tail_mask=needs_tail_mask),
        out_shape=jax.ShapeDtypeStruct((nsplit * 8, cols), jnp.float32),
        grid_spec=pltpu.PrefetchScalarGridSpec(
            num_scalar_prefetch=0,
            grid=(nsplit, tiles_per_split),
            in_specs=[pl.BlockSpec((tile_rows, cols), in_map),
                      pl.BlockSpec((tile_rows, cols), in_map)],
            out_specs=pl.BlockSpec((8, cols), lambda c, k: (c, 0)),
            scratch_shapes=[pltpu.VMEM((8, cols), jnp.float32)],
        ),
        compiler_params=pltpu.CompilerParams(
            dimension_semantics=sem, vmem_limit_bytes=vmem_limit),
    )(p2d, t2d)

    # Tiny (nsplit*8, cols) -> scalar reduce done in XLA.
    total = jnp.sum(partials)
    if n_rem:
        total = total + _xla_elem(p_flat[n_main:], t_flat[n_main:]).sum()
    if reduction == "sum":
        return total
    return total / jnp.float32(n)


if __name__ == "__main__":
    key = jax.random.PRNGKey(0)
    k1, k2 = jax.random.split(key)
    # NCHW inputs, same as the PyTorch module would receive.
    x_shape = (2, 4, 16, 16)
    y_pred = jax.random.normal(k1, x_shape, dtype=jnp.float32)
    y_true = jax.random.normal(k2, x_shape, dtype=jnp.float32)
    eps = 1e-9

    loss_mean = jax.block_until_ready(rmse_loss(y_pred, y_true, "mean", eps))
    loss_sum = jax.block_until_ready(rmse_loss(y_pred, y_true, "sum", eps))
    loss_none = jax.block_until_ready(rmse_loss(y_pred, y_true, "none", eps))

    # Pure-JAX reference (matches the PyTorch module: elementwise
    # sqrt(squared error + eps), then reduce).
    ref_elem = jnp.sqrt((y_pred - y_true) ** 2 + eps)
    assert jnp.allclose(loss_mean, ref_elem.mean(), rtol=1e-5, atol=1e-6)
    assert jnp.allclose(loss_sum, ref_elem.sum(), rtol=1e-5, atol=1e-4)
    assert loss_none.shape == x_shape
    assert jnp.allclose(loss_none, ref_elem, rtol=1e-5, atol=1e-6)

    # Native bf16 inputs: no wrapper upcast, cast happens inside the kernel.
    yp_bf = y_pred.astype(jnp.bfloat16)
    yt_bf = y_true.astype(jnp.bfloat16)
    loss_bf = jax.block_until_ready(rmse_loss(yp_bf, yt_bf, "mean", eps))
    ref_bf = jnp.sqrt(
        (yp_bf.astype(jnp.float32) - yt_bf.astype(jnp.float32)) ** 2 + eps).mean()
    assert jnp.allclose(loss_bf, ref_bf, rtol=1e-4, atol=1e-5)

    # Awkward size exercising the aligned-prefix + XLA-tail path (no jnp.pad).
    z_shape = (17, 130)
    zp = jax.random.normal(k1, z_shape, dtype=jnp.float32)
    zt = jax.random.normal(k2, z_shape, dtype=jnp.float32)
    ref_z = jnp.sqrt((zp - zt) ** 2 + eps)
    loss_z_mean = jax.block_until_ready(rmse_loss(zp, zt, "mean", eps))
    loss_z_none = jax.block_until_ready(rmse_loss(zp, zt, "none", eps))
    assert jnp.allclose(loss_z_mean, ref_z.mean(), rtol=1e-5, atol=1e-6)
    assert jnp.allclose(loss_z_none, ref_z, rtol=1e-5, atol=1e-6)

    print("KERNEL_OK")
</pallas_src>

<mosaic_0001>
module attributes {stable_mosaic.version = 11 : i64} {
  func.func @_rmse_sum_kernel(%arg0: i32, %arg1: i32, %arg2: memref<8x256xf32, #tpu.memory_space<vmem>>, %arg3: memref<8x256xf32, #tpu.memory_space<vmem>>, %arg4: memref<8x256xf32, #tpu.memory_space<vmem>>, %arg5: memref<8x256xf32, #tpu.memory_space<vmem>>) attributes {dimension_semantics = [#tpu.dimension_semantics<arbitrary>, #tpu.dimension_semantics<arbitrary>], iteration_bounds = array<i64: 1, 1>, scalar_prefetch = 0 : i64, scratch_operands = 1 : i64, tpu.core_type = #tpu.core_type<tc>, window_params = [{transform_indices = @transform_0, window_bounds = array<i64: 8, 256>}, {transform_indices = @transform_1, window_bounds = array<i64: 8, 256>}, {transform_indices = @transform_2, window_bounds = array<i64: 8, 256>}]} {
    %c0_i32 = arith.constant 0 : i32
    %0 = arith.cmpi eq, %arg1, %c0_i32 : i32
    %1 = arith.extui %0 : i1 to i32
    %c0_i32_0 = arith.constant 0 : i32
    %2 = arith.cmpi ne, %1, %c0_i32_0 : i32
    scf.if %2 {
      %cst_11 = arith.constant 0.000000e+00 : f32
      %18 = vector.broadcast %cst_11 : f32 to vector<8x256xf32>
      %c0_12 = arith.constant 0 : index
      %c0_13 = arith.constant 0 : index
      %19 = vector.load %arg5[%c0_12, %c0_13] : memref<8x256xf32, #tpu.memory_space<vmem>>, vector<8x256xf32>
      tpu.vector_store %arg5[%c0_12, %c0_13], %18 {strides = array<i32>} : memref<8x256xf32, #tpu.memory_space<vmem>>, vector<8x256xf32>,
    } else {
    }
    %c0 = arith.constant 0 : index
    %c0_1 = arith.constant 0 : index
    %3 = vector.load %arg2[%c0, %c0_1] : memref<8x256xf32, #tpu.memory_space<vmem>>, vector<8x256xf32>
    %c0_2 = arith.constant 0 : index
    %c0_3 = arith.constant 0 : index
    %4 = vector.load %arg3[%c0_2, %c0_3] : memref<8x256xf32, #tpu.memory_space<vmem>>, vector<8x256xf32>
    %5 = arith.subf %3, %4 : vector<8x256xf32>
    %6 = arith.mulf %5, %5 : vector<8x256xf32>
    %cst = arith.constant 9.99999971E-10 : f32
    %7 = vector.broadcast %cst : f32 to vector<8x256xf32>
    %8 = arith.addf %6, %7 : vector<8x256xf32>
    %9 = math.sqrt %8 : vector<8x256xf32>
    %c0_4 = arith.constant 0 : index
    %c0_5 = arith.constant 0 : index
    %10 = vector.load %arg5[%c0_4, %c0_5] : memref<8x256xf32, #tpu.memory_space<vmem>>, vector<8x256xf32>
    %11 = vector.shape_cast %9 : vector<8x256xf32> to vector<1x8x256xf32>
    %cst_6 = arith.constant dense<0.000000e+00> : vector<8x256xf32>
    %12 = vector.multi_reduction <add>, %11, %cst_6 [0] : vector<1x8x256xf32> to vector<8x256xf32>
    %13 = arith.addf %10, %12 : vector<8x256xf32>
    %c0_7 = arith.constant 0 : index
    %c0_8 = arith.constant 0 : index
    %14 = vector.load %arg5[%c0_7, %c0_8] : memref<8x256xf32, #tpu.memory_space<vmem>>, vector<8x256xf32>
    tpu.vector_store %arg5[%c0_7, %c0_8], %13 {strides = array<i32>} : memref<8x256xf32, #tpu.memory_space<vmem>>, vector<8x256xf32>,
    %c0_i32_9 = arith.constant 0 : i32
    %15 = arith.cmpi eq, %arg1, %c0_i32_9 : i32
    %16 = arith.extui %15 : i1 to i32
    %c0_i32_10 = arith.constant 0 : i32
    %17 = arith.cmpi ne, %16, %c0_i32_10 : i32
    scf.if %17 {
      %c0_11 = arith.constant 0 : index
      %c0_12 = arith.constant 0 : index
      %18 = vector.load %arg5[%c0_11, %c0_12] : memref<8x256xf32, #tpu.memory_space<vmem>>, vector<8x256xf32>
      %c0_13 = arith.constant 0 : index
      %c0_14 = arith.constant 0 : index
      %19 = vector.load %arg4[%c0_13, %c0_14] : memref<8x256xf32, #tpu.memory_space<vmem>>, vector<8x256xf32>
      tpu.vector_store %arg4[%c0_13, %c0_14], %18 {strides = array<i32>} : memref<8x256xf32, #tpu.memory_space<vmem>>, vector<8x256xf32>,
    } else {
    }
    return
  }
  func.func @transform_0(%arg0: i32, %arg1: i32) -> (i32, i32) {
    %c1_i32 = arith.constant 1 : i32
    %0 = arith.muli %arg0, %c1_i32 : i32
    %1 = arith.addi %0, %arg1 : i32
    %c0_i32 = arith.constant 0 : i32
    %c0_i32_0 = arith.constant 0 : i32
    return %1, %c0_i32 : i32, i32
  }
  func.func @transform_1(%arg0: i32, %arg1: i32) -> (i32, i32) {
    %c1_i32 = arith.constant 1 : i32
    %0 = arith.muli %arg0, %c1_i32 : i32
    %1 = arith.addi %0, %arg1 : i32
    %c0_i32 = arith.constant 0 : i32
    %c0_i32_0 = arith.constant 0 : i32
    return %1, %c0_i32 : i32, i32
  }
  func.func @transform_2(%arg0: i32, %arg1: i32) -> (i32, i32) {
    %c0_i32 = arith.constant 0 : i32
    %c0_i32_0 = arith.constant 0 : i32
    return %arg0, %c0_i32 : i32, i32
  }
}

</mosaic_0001>

<bundles_post_ra>
// kernel: tpu_custom_call.1
= control target key start
LH: loop header
LB: loop body
LE: loop exit
PB: predicated region body
PF: predicated region fallthrough
CT: control target
= control target key end

     0   :  { %7 = vsyncpa [#allocation4], 0  ;;  %s235_s0 = inlined_call_operand.hbm [shape: f32[8,256], index: 0, kind: input, shape index: {}]   ;;  %s236_s1 = inlined_call_operand.hbm [shape: f32[8,256], index: 1, kind: input, shape index: {}]   ;;  %s237_s2 = inlined_call_operand.hbm [shape: f32[8,256], index: 2, kind: output, shape index: {}]  }
   0x1   :  { %8 = vsyncpa [#allocation7], 0 }
   0x2   :  { %9 = vsyncpa [#allocation5], 0  ;;  %s19_s11 = sshll.u32 %s235_s0, 4  ;;  %s208_s12 = smov [#allocation3]   ;;  %s20_s11 = int_to_ptr.hbm [resolvable:$true] %s19_s11 }
   0x3   :  { %s21_s13 = sshll.u32 %s208_s12, 4  ;;  %s34_s16 = sshll.u32 %s236_s1, 4  ;;  %s22_s13 = int_to_ptr.vmem [resolvable:$true] %s21_s13  ;;  %s35_s16 = int_to_ptr.hbm [resolvable:$true] %s34_s16 }
   0x4   :  { %24 = dma.hbm_to_vmem [thread:$0]  %s20_s11, 256, %s22_s13, [#allocation4]  }
   0x5   :  { %s209_s17 = smov [#allocation6]  }
   0x6   :  { %s36_s18 = sshll.u32 %s209_s17, 4  ;;  %s37_s18 = int_to_ptr.vmem [resolvable:$true] %s36_s18 }
   0x7   :  { %39 = dma.hbm_to_vmem [thread:$0]  %s35_s16, 256, %s37_s18, [#allocation7]  }
   0x8   :  { %202 = dma.done.wait [#allocation4], 256  }
   0x9   :  { %203 = vsyncadd [#allocation4], 4294967040 }
   0xa   :  { %204 = dma.done.wait [#allocation7], 256  }
   0xb   :  { %205 = vsyncadd [#allocation7], 4294967040  ;;  %v56_v0 = vld [vmem:[#allocation3] sm:$0xff]  ;;  %v58_v1 = vld [vmem:[#allocation6] sm:$0xff]  ;;  %s210_s0 = smov [#allocation8]   ;;  %s112_s21 = sshll.u32 %s237_s2, 4  ;;  %s113_s21 = int_to_ptr.hbm [resolvable:$true] %s112_s21 }
   0xc   :  { %v57_v2 = vld [vmem:[#allocation3 + $0x8] sm:$0xff]  ;;  %v60_v3 = vsub.f32 %v56_v0, %v58_v1  ;;  %v59_v4 = vld [vmem:[#allocation6 + $0x8] sm:$0xff]  ;;  %s110_s1 = sshll.u32 %s210_s0, 4  ;;  %s111_s1 = int_to_ptr.vmem [resolvable:$true] %s110_s1 }
   0xd   :  { %v61_v5 = vsub.f32 %v57_v2, %v59_v4 }
   0xe   :  { %v62_v6 = vmul.f32 %v60_v3, %v60_v3 }
   0xf   :  { %v63_v7 = vmul.f32 %v61_v5, %v61_v5 }
  0x10   :  { %v64_v8 = vadd.f32 1e-09, %v62_v6 }
  0x11   :  { %v65_v9 = vadd.f32 1e-09, %v63_v7 }
  0x12   :  { %126 = vrsqrt.f32 %v64_v8  ;;  %vm73_vm0 = vcmp.eq.f32.partialorder %v64_v8, inf  ;;  %v76_v21 = vand.u32 2147483648, %v64_v8  ;;  %vm75_vm1 = vcmp.eq.f32.partialorder %v64_v8, 0.0 }
  0x13   :  { %128 = vrsqrt.f32 %v65_v9  ;;  %vm85_vm2 = vcmp.eq.f32.partialorder %v65_v9, inf  ;;  %v88_v24 = vand.u32 2147483648, %v65_v9  ;;  %vm87_vm3 = vcmp.eq.f32.partialorder %v65_v9, 0.0 }
  0x18   :  { %v127_v10 = vpop.eup %126 }
  0x19   :  { %v129_v11 = vpop.eup %128  ;;  %v67_v12 = vmul.f32 %v127_v10, %v64_v8 }
  0x1a   :  { %v79_v13 = vmul.f32 %v129_v11, %v65_v9 }
  0x1b   :  { %v68_v14 = vmul.f32 %v127_v10, %v67_v12 }
  0x1c   :  { %v80_v15 = vmul.f32 %v129_v11, %v79_v13 }
  0x1d   :  { %v69_v16 = vmul.f32 0.5, %v68_v14 }
  0x1e   :  { %v81_v17 = vmul.f32 0.5, %v80_v15 }
  0x1f   :  { %v70_v18 = vsub.f32 1.5, %v69_v16 }
  0x20   :  { %v82_v19 = vsub.f32 1.5, %v81_v17 }
  0x21   :  { %v71_v20 = vmul.f32 %v127_v10, %v70_v18 }
  0x22   :  { %v83_v22 = vmul.f32 %v129_v11, %v82_v19 }
  0x23   :  { %v72_v23 = vmul.f32 %v71_v20, %v64_v8 }
  0x24   :  { %v84_v25 = vmul.f32 %v83_v22, %v65_v9 }
  0x25   :  { %v74_v26 = vsel %vm73_vm0, %v64_v8, %v72_v23 }
  0x26   :  { %v77_v27 = vsel %vm75_vm1, %v76_v21, %v74_v26  ;;  %v86_v28 = vsel %vm85_vm2, %v65_v9, %v84_v25 }
  0x27   :  { %103 = vst [vmem:[#allocation8] sm:$0xff] %v77_v27  ;;  %v89_v29 = vsel %vm87_vm3, %v88_v24, %v86_v28 }
  0x28   :  { %104 = vst [vmem:[#allocation8 + $0x8] sm:$0xff] %v89_v29 }
  0x29   :  { %115 = dma.vmem_to_hbm [thread:$0]  %s111_s1, 256, %s113_s21, [#allocation5]  }
  0x2a   :  { %206 = dma.done.wait [#allocation5], 256  }
  0x2b   :  { %207 = vsyncadd [#allocation5], 4294967040 }
  0x2c   :  { %120 = vsyncpa [#allocation4], 1 }
  0x2d   :  { %121 = vsyncpa [#allocation7], 1 }
  0x2e   :  { %122 = vsyncpa [#allocation5], 1 }

</bundles_post_ra>
